<compile_context>
chip_gen: v6e
topology: v6e:2x2x1
jax: 0.10.0
libtpu: 0.0.40
codegen_flags: <defaults>
</compile_context>

<pallas_src>
import functools

import jax
import jax.numpy as jnp
from jax import lax
from jax.experimental import pallas as pl
from jax.experimental.pallas import tpu as pltpu


# ---------------------------------------------------------------------------
# Pallas kernel: one grid step == one FPN key, all relations fused in M.
# ---------------------------------------------------------------------------
def _fused_attention_kernel(patches_ref, feat_ref, w1_ref, b1_ref,
                            wsa_ref, wfpn_ref, o_ref, *, num_rels):
    # Stage 1: 3x3 conv as a single transposed im2col matmul (+bias, ReLU).
    #   w1      : [SA, 9*Cm]        (bf16)
    #   patches : [9*Cm, R*HWmax]   (bf16, columns ordered (rel, y, x))
    r = jnp.dot(w1_ref[0], patches_ref[0],
                preferred_element_type=jnp.float32)            # [SA, M] f32
    r = jnp.maximum(r + b1_ref[0], 0.0)

    # Stage 2a: relation-dependent half of the 1x1 bottleneck conv.
    sa_out = jnp.dot(wsa_ref[0], r.astype(jnp.bfloat16),
                     preferred_element_type=jnp.float32)       # [Cb, M]

    # Stage 2b: relation-independent FPN half -- computed ONCE, tiled over rels.
    fpn_out = jnp.dot(wfpn_ref[0], feat_ref[0],
                      preferred_element_type=jnp.float32)      # [Cb, HWmax]
    fpn_tiled = jnp.concatenate([fpn_out] * num_rels, axis=1)  # [Cb, M]

    # Final ReLU, lane-dense store (lane dim = R*HWmax, multiple of 128).
    o_ref[0] = jnp.maximum(sa_out + fpn_tiled, 0.0).astype(o_ref.dtype)


def _fused_all_keys(patches_all, feat_all, w1_all, b1_all, wsa_all, wfpn_all,
                    num_rels):
    nk, kdim, m_max = patches_all.shape          # kdim = 9*Cm, m_max = R*HWmax
    fpn, hw_max = feat_all.shape[1], feat_all.shape[2]
    sa = w1_all.shape[1]
    cb = wsa_all.shape[1]
    kernel = functools.partial(_fused_attention_kernel, num_rels=num_rels)
    return pl.pallas_call(
        kernel,
        out_shape=jax.ShapeDtypeStruct((nk, cb, m_max), jnp.float32),
        grid_spec=pltpu.PrefetchScalarGridSpec(
            num_scalar_prefetch=0,
            grid=(nk,),
            in_specs=[
                pl.BlockSpec((1, kdim, m_max), lambda k: (k, 0, 0)),
                pl.BlockSpec((1, fpn, hw_max), lambda k: (k, 0, 0)),
                pl.BlockSpec((1, sa, kdim), lambda k: (k, 0, 0)),
                pl.BlockSpec((1, sa, 1), lambda k: (k, 0, 0)),
                pl.BlockSpec((1, cb, sa), lambda k: (k, 0, 0)),
                pl.BlockSpec((1, cb, fpn), lambda k: (k, 0, 0)),
            ],
            out_specs=pl.BlockSpec((1, cb, m_max), lambda k: (k, 0, 0)),
        ),
        compiler_params=pltpu.CompilerParams(
            dimension_semantics=("parallel",)),   # keys independent (v7x 2-TC)
    )(patches_all, feat_all, w1_all, b1_all, wsa_all, wfpn_all)


# ---------------------------------------------------------------------------
# Host-side glue (gather/pad/transpose only; no compute).
# ---------------------------------------------------------------------------
def _resize_nearest_nchw(x, out_h, out_w):
    # Matches F.interpolate(mode='nearest'): src = floor(dst * in / out)
    _, _, in_h, in_w = x.shape
    hi = jnp.clip(jnp.floor(jnp.arange(out_h) * (in_h / out_h)).astype(jnp.int32),
                  0, in_h - 1)
    wi = jnp.clip(jnp.floor(jnp.arange(out_w) * (in_w / out_w)).astype(jnp.int32),
                  0, in_w - 1)
    return x[:, :, hi, :][:, :, :, wi]


def _im2col3x3_t(mask_nchw):
    """Transposed im2col: [R, Cm, H, W] -> [9*Cm, R, H*W], rows ordered (ky,kx,c)."""
    r, cm, h, w = mask_nchw.shape
    xp = jnp.pad(mask_nchw, ((0, 0), (0, 0), (1, 1), (1, 1)))
    slabs = [xp[:, :, ky:ky + h, kx:kx + w]
             for ky in range(3) for kx in range(3)]
    cat = jnp.concatenate(slabs, axis=1)                  # [R, 9*Cm, H, W]
    return jnp.transpose(cat, (1, 0, 2, 3)).reshape(9 * cm, r, h * w)


def init_params(key, keys_list, cm, sa, fpn, cb):
    """Deterministic synthetic params, PyTorch weight layouts."""
    params = {}
    for i, k in enumerate(keys_list):
        k1, k2, k3 = jax.random.split(jax.random.fold_in(key, i), 3)
        w_conv = jax.random.normal(k1, (sa, cm, 3, 3), jnp.float32) * 0.05   # [O,I,kh,kw]
        b_conv = jax.random.normal(k2, (sa,), jnp.float32) * 0.05
        w_bottle = jax.random.normal(k3, (cb, sa + fpn), jnp.float32) * 0.05  # 1x1, no bias
        params[k] = (w_conv, b_conv, w_bottle)
    return params


def rd_soft_attention_forward(features, soft_mask, params, keys_list):
    """Pallas implementation of RdSoftAttentionMechanism.forward (NCHW in/out)."""
    num_rels = soft_mask.shape[0]
    shapes = {k: tuple(features[k].shape[-2:]) for k in keys_list}
    hw_max = max(h * w for (h, w) in shapes.values())
    hw_max = ((hw_max + 127) // 128) * 128               # lane-dense padding

    mask_bf16 = soft_mask.astype(jnp.bfloat16)

    p_l, f_l, w1_l, b1_l, wsa_l, wfpn_l = [], [], [], [], [], []
    for k in keys_list:
        h, w = shapes[k]
        hw = h * w
        w_conv, b_conv, w_bottle = params[k]
        sa, cm = w_conv.shape[0], w_conv.shape[1]
        fpn = features[k].shape[1]

        # resize (nearest, gather only) + transposed im2col, pad spatial to hw_max
        mask_r = _resize_nearest_nchw(mask_bf16, h, w)          # [R, Cm, H, W]
        patches = _im2col3x3_t(mask_r)                          # [9Cm, R, HW]
        patches = jnp.pad(patches, ((0, 0), (0, 0), (0, hw_max - hw)))
        p_l.append(patches.reshape(9 * cm, num_rels * hw_max))  # [9Cm, R*HWmax]

        # NCHW features are already channels-major: just flatten + pad
        feat_t = features[k][0].reshape(fpn, hw).astype(jnp.bfloat16)
        f_l.append(jnp.pad(feat_t, ((0, 0), (0, hw_max - hw)))) # [FPN, HWmax]

        # weight repacking (tiny)
        w1_l.append(jnp.transpose(w_conv, (0, 2, 3, 1))
                    .reshape(sa, 9 * cm).astype(jnp.bfloat16))  # [SA, 9Cm] (ky,kx,c)
        b1_l.append(b_conv.reshape(sa, 1).astype(jnp.float32))  # [SA, 1]
        wsa_l.append(w_bottle[:, :sa].astype(jnp.bfloat16))     # [Cb, SA]
        wfpn_l.append(w_bottle[:, sa:].astype(jnp.bfloat16))    # [Cb, FPN]

    out_all = _fused_all_keys(
        jnp.stack(p_l), jnp.stack(f_l), jnp.stack(w1_l),
        jnp.stack(b1_l), jnp.stack(wsa_l), jnp.stack(wfpn_l),
        num_rels)                                               # [nk, Cb, R*HWmax]

    outs = {}
    for i, k in enumerate(keys_list):
        h, w = shapes[k]
        cb = params[k][2].shape[0]
        o = out_all[i].reshape(cb, num_rels, hw_max)[:, :, :h * w]
        outs[k] = jnp.transpose(o, (1, 0, 2)).reshape(num_rels, cb, h, w)
    return outs


# ---------------------------------------------------------------------------
# Pure-JAX NCHW reference mirroring the PyTorch module (f32).
# ---------------------------------------------------------------------------
def reference_forward(features, soft_mask, params, keys_list):
    num_rels = soft_mask.shape[0]
    outs = {}
    for k in keys_list:
        feat = features[k]
        h, w = feat.shape[-2:]
        w_conv, b_conv, w_bottle = params[k]
        mask_r = _resize_nearest_nchw(soft_mask.astype(jnp.float32), h, w)
        conv = lax.conv_general_dilated(
            mask_r, w_conv, window_strides=(1, 1), padding=((1, 1), (1, 1)),
            dimension_numbers=('NCHW', 'OIHW', 'NCHW'))
        relu = jnp.maximum(conv + b_conv[None, :, None, None], 0.0)
        feat_tiled = jnp.concatenate([feat] * num_rels, axis=0)
        cat = jnp.concatenate([relu, feat_tiled], axis=1)
        bott = lax.conv_general_dilated(
            cat, w_bottle[:, :, None, None], window_strides=(1, 1),
            padding='VALID', dimension_numbers=('NCHW', 'OIHW', 'NCHW'))
        outs[k] = jnp.maximum(bott, 0.0)
    return outs


if __name__ == "__main__":
    key = jax.random.PRNGKey(0)
    FPN, CM, SA, CB = 32, 8, 32, 16          # small, consistent with module layout
    keys_list = ['0', '1', '2', 'pool']
    spatial = {'0': 16, '1': 8, '2': 4, 'pool': 4}
    num_rels = 2

    kf, km, kp = jax.random.split(key, 3)
    features = {
        k: jax.random.normal(jax.random.fold_in(kf, i),
                             (1, FPN, spatial[k], spatial[k]), jnp.float32)
        for i, k in enumerate(keys_list)
    }
    soft_mask = jax.random.normal(km, (num_rels, CM, 24, 24), jnp.float32)
    params = init_params(kp, keys_list, CM, SA, FPN, CB)

    fwd = jax.jit(functools.partial(rd_soft_attention_forward,
                                    keys_list=keys_list))
    outs = fwd(features, soft_mask, params)
    outs = {k: jax.block_until_ready(v) for k, v in outs.items()}

    refs = reference_forward(features, soft_mask, params, keys_list)
    for k in keys_list:
        assert outs[k].shape == (num_rels, CB, spatial[k], spatial[k]), outs[k].shape
        err = float(jnp.max(jnp.abs(outs[k] - refs[k])))
        assert err < 5e-2, (k, err)   # bf16 operands, f32 accumulation

    print("KERNEL_OK")
</pallas_src>

<mosaic_0001>
module attributes {stable_mosaic.version = 11 : i64} {
  func.func @_fused_attention_kernel(%arg0: i32, %arg1: memref<1x72x512xbf16, #tpu.memory_space<vmem>>, %arg2: memref<1x32x256xbf16, #tpu.memory_space<vmem>>, %arg3: memref<1x32x72xbf16, #tpu.memory_space<vmem>>, %arg4: memref<1x32x1xf32, #tpu.memory_space<vmem>>, %arg5: memref<1x16x32xbf16, #tpu.memory_space<vmem>>, %arg6: memref<1x16x32xbf16, #tpu.memory_space<vmem>>, %arg7: memref<1x16x512xf32, #tpu.memory_space<vmem>>) attributes {dimension_semantics = [#tpu.dimension_semantics<parallel>], iteration_bounds = array<i64: 4>, scalar_prefetch = 0 : i64, scratch_operands = 0 : i64, tpu.core_type = #tpu.core_type<tc>, window_params = [{transform_indices = @transform_0, window_bounds = array<i64: 1, 72, 512>}, {transform_indices = @transform_1, window_bounds = array<i64: 1, 32, 256>}, {transform_indices = @transform_2, window_bounds = array<i64: 1, 32, 72>}, {transform_indices = @transform_3, window_bounds = array<i64: 1, 32, 1>}, {transform_indices = @transform_4, window_bounds = array<i64: 1, 16, 32>}, {transform_indices = @transform_5, window_bounds = array<i64: 1, 16, 32>}, {transform_indices = @transform_6, window_bounds = array<i64: 1, 16, 512>}]} {
    %c0 = arith.constant 0 : index
    %c0_0 = arith.constant 0 : index
    %c0_1 = arith.constant 0 : index
    %0 = vector.load %arg3[%c0, %c0_0, %c0_1] : memref<1x32x72xbf16, #tpu.memory_space<vmem>>, vector<1x32x72xbf16>
    %1 = vector.shape_cast %0 : vector<1x32x72xbf16> to vector<32x72xbf16>
    %c0_2 = arith.constant 0 : index
    %c0_3 = arith.constant 0 : index
    %c0_4 = arith.constant 0 : index
    %2 = vector.load %arg1[%c0_2, %c0_3, %c0_4] : memref<1x72x512xbf16, #tpu.memory_space<vmem>>, vector<1x72x512xbf16>
    %3 = vector.shape_cast %2 : vector<1x72x512xbf16> to vector<72x512xbf16>
    %cst = arith.constant dense<0.000000e+00> : vector<32x512xf32>
    %4 = tpu.matmul %1, %3, %cst {dimension_numbers = #tpu.dot_dimension_numbers<[1], [0], [0], [1], [0, 0, 1, 1], [], []>} : vector<32x72xbf16>, vector<72x512xbf16>, vector<32x512xf32> -> vector<32x512xf32>
    %c0_5 = arith.constant 0 : index
    %c0_6 = arith.constant 0 : index
    %c0_7 = arith.constant 0 : index
    %5 = vector.load %arg4[%c0_5, %c0_6, %c0_7] : memref<1x32x1xf32, #tpu.memory_space<vmem>>, vector<1x32x1xf32>
    %6 = vector.shape_cast %5 : vector<1x32x1xf32> to vector<32x1xf32>
    %7 = vector.broadcast %6 : vector<32x1xf32> to vector<32x512xf32>
    %8 = arith.addf %4, %7 : vector<32x512xf32>
    %cst_8 = arith.constant 0.000000e+00 : f32
    %9 = vector.broadcast %cst_8 : f32 to vector<32x512xf32>
    %10 = arith.maximumf %8, %9 : vector<32x512xf32>
    %c0_9 = arith.constant 0 : index
    %c0_10 = arith.constant 0 : index
    %c0_11 = arith.constant 0 : index
    %11 = vector.load %arg5[%c0_9, %c0_10, %c0_11] : memref<1x16x32xbf16, #tpu.memory_space<vmem>>, vector<1x16x32xbf16>
    %12 = vector.shape_cast %11 : vector<1x16x32xbf16> to vector<16x32xbf16>
    %13 = arith.truncf %10 : vector<32x512xf32> to vector<32x512xbf16>
    %cst_12 = arith.constant dense<0.000000e+00> : vector<16x512xf32>
    %14 = tpu.matmul %12, %13, %cst_12 {dimension_numbers = #tpu.dot_dimension_numbers<[1], [0], [0], [1], [0, 0, 1, 1], [], []>} : vector<16x32xbf16>, vector<32x512xbf16>, vector<16x512xf32> -> vector<16x512xf32>
    %c0_13 = arith.constant 0 : index
    %c0_14 = arith.constant 0 : index
    %c0_15 = arith.constant 0 : index
    %15 = vector.load %arg6[%c0_13, %c0_14, %c0_15] : memref<1x16x32xbf16, #tpu.memory_space<vmem>>, vector<1x16x32xbf16>
    %16 = vector.shape_cast %15 : vector<1x16x32xbf16> to vector<16x32xbf16>
    %c0_16 = arith.constant 0 : index
    %c0_17 = arith.constant 0 : index
    %c0_18 = arith.constant 0 : index
    %17 = vector.load %arg2[%c0_16, %c0_17, %c0_18] : memref<1x32x256xbf16, #tpu.memory_space<vmem>>, vector<1x32x256xbf16>
    %18 = vector.shape_cast %17 : vector<1x32x256xbf16> to vector<32x256xbf16>
    %cst_19 = arith.constant dense<0.000000e+00> : vector<16x256xf32>
    %19 = tpu.matmul %16, %18, %cst_19 {dimension_numbers = #tpu.dot_dimension_numbers<[1], [0], [0], [1], [0, 0, 1, 1], [], []>} : vector<16x32xbf16>, vector<32x256xbf16>, vector<16x256xf32> -> vector<16x256xf32>
    %20 = tpu.concatenate %19, %19 in 1 : vector<16x256xf32>, vector<16x256xf32> -> vector<16x512xf32>
    %21 = arith.addf %14, %20 : vector<16x512xf32>
    %cst_20 = arith.constant 0.000000e+00 : f32
    %22 = vector.broadcast %cst_20 : f32 to vector<16x512xf32>
    %23 = arith.maximumf %21, %22 : vector<16x512xf32>
    %c0_21 = arith.constant 0 : index
    %c0_22 = arith.constant 0 : index
    %c0_23 = arith.constant 0 : index
    %24 = vector.load %arg7[%c0_21, %c0_22, %c0_23] : memref<1x16x512xf32, #tpu.memory_space<vmem>>, vector<1x16x512xf32>
    %25 = vector.shape_cast %24 : vector<1x16x512xf32> to vector<16x512xf32>
    %26 = vector.shape_cast %23 : vector<16x512xf32> to vector<1x16x512xf32>
    tpu.vector_store %arg7[%c0_21, %c0_22, %c0_23], %26 {strides = array<i32>} : memref<1x16x512xf32, #tpu.memory_space<vmem>>, vector<1x16x512xf32>,
    return
  }
  func.func @transform_0(%arg0: i32) -> (i32, i32, i32) {
    %c0_i32 = arith.constant 0 : i32
    %c0_i32_0 = arith.constant 0 : i32
    %c0_i32_1 = arith.constant 0 : i32
    return %arg0, %c0_i32, %c0_i32_0 : i32, i32, i32
  }
  func.func @transform_1(%arg0: i32) -> (i32, i32, i32) {
    %c0_i32 = arith.constant 0 : i32
    %c0_i32_0 = arith.constant 0 : i32
    %c0_i32_1 = arith.constant 0 : i32
    return %arg0, %c0_i32, %c0_i32_0 : i32, i32, i32
  }
  func.func @transform_2(%arg0: i32) -> (i32, i32, i32) {
    %c0_i32 = arith.constant 0 : i32
    %c0_i32_0 = arith.constant 0 : i32
    %c0_i32_1 = arith.constant 0 : i32
    return %arg0, %c0_i32, %c0_i32_0 : i32, i32, i32
  }
  func.func @transform_3(%arg0: i32) -> (i32, i32, i32) {
    %c0_i32 = arith.constant 0 : i32
    %c0_i32_0 = arith.constant 0 : i32
    %c0_i32_1 = arith.constant 0 : i32
    return %arg0, %c0_i32, %c0_i32_0 : i32, i32, i32
  }
  func.func @transform_4(%arg0: i32) -> (i32, i32, i32) {
    %c0_i32 = arith.constant 0 : i32
    %c0_i32_0 = arith.constant 0 : i32
    %c0_i32_1 = arith.constant 0 : i32
    return %arg0, %c0_i32, %c0_i32_0 : i32, i32, i32
  }
  func.func @transform_5(%arg0: i32) -> (i32, i32, i32) {
    %c0_i32 = arith.constant 0 : i32
    %c0_i32_0 = arith.constant 0 : i32
    %c0_i32_1 = arith.constant 0 : i32
    return %arg0, %c0_i32, %c0_i32_0 : i32, i32, i32
  }
  func.func @transform_6(%arg0: i32) -> (i32, i32, i32) {
    %c0_i32 = arith.constant 0 : i32
    %c0_i32_0 = arith.constant 0 : i32
    %c0_i32_1 = arith.constant 0 : i32
    return %arg0, %c0_i32, %c0_i32_0 : i32, i32, i32
  }
}

</mosaic_0001>

<bundles_post_ra>
// kernel: squeeze.12
= control target key start
LH: loop header
LB: loop body
LE: loop exit
PB: predicated region body
PF: predicated region fallthrough
CT: control target
= control target key end

     0   :  { %s499_s0 = inlined_call_operand.vmem [shape: f32[1,16,512], index: 0, kind: input, shape index: {}]   ;;  %s500_s1 = inlined_call_operand.vmem [shape: f32[16,2,256], index: 1, kind: output, shape index: {}]  }
   0x1   :  { %v2_v0 = vld [vmem:[%s499_s0] sm:$0xff]   ;;  %v331_v1 = vld [vmem:[%s499_s0 + $0x8] sm:$0xff]   ;;  %v332_v2 = vld [vmem:[%s499_s0 + $0x10] sm:$0xff]  }
   0x2   :  { %3 = vst [vmem:[#allocation0] ss:$16 sm:$0x3] %v2_v0   ;;  %4 = vst [vmem:[#allocation0] ss:$16 sm:$0xc] %v2_v0  }
   0x3   :  { %5 = vst [vmem:[#allocation0] ss:$16 sm:$0x30] %v2_v0   ;;  %6 = vst [vmem:[#allocation0] ss:$16 sm:$0xc0] %v2_v0  }
   0x4   :  { %10 = vst [vmem:[#allocation0 + $0x8] ss:$16 sm:$0x3] %v331_v1   ;;  %12 = vst [vmem:[#allocation0 + $0x8] ss:$16 sm:$0xc] %v331_v1  }
   0x5   :  { %14 = vst [vmem:[#allocation0 + $0x8] ss:$16 sm:$0x30] %v331_v1   ;;  %16 = vst [vmem:[#allocation0 + $0x8] ss:$16 sm:$0xc0] %v331_v1  }
   0x6   :  { %20 = vst [vmem:[#allocation0 + $0x1] ss:$16 sm:$0x3] %v332_v2   ;;  %22 = vst [vmem:[#allocation0 + $0x1] ss:$16 sm:$0xc] %v332_v2  }
   0x7   :  { %24 = vst [vmem:[#allocation0 + $0x1] ss:$16 sm:$0x30] %v332_v2   ;;  %26 = vst [vmem:[#allocation0 + $0x1] ss:$16 sm:$0xc0] %v332_v2  }
   0x8   :  { %v333_v3 = vld [vmem:[%s499_s0 + $0x18] sm:$0xff]   ;;  %v334_v4 = vld [vmem:[%s499_s0 + $0x20] sm:$0xff]   ;;  %v335_v5 = vld [vmem:[%s499_s0 + $0x28] sm:$0xff]  }
   0x9   :  { %30 = vst [vmem:[#allocation0 + $0x9] ss:$16 sm:$0x3] %v333_v3   ;;  %32 = vst [vmem:[#allocation0 + $0x9] ss:$16 sm:$0xc] %v333_v3  }
   0xa   :  { %34 = vst [vmem:[#allocation0 + $0x9] ss:$16 sm:$0x30] %v333_v3   ;;  %36 = vst [vmem:[#allocation0 + $0x9] ss:$16 sm:$0xc0] %v333_v3  }
   0xb   :  { %40 = vst [vmem:[#allocation0 + $0x80] ss:$16 sm:$0x3] %v334_v4   ;;  %42 = vst [vmem:[#allocation0 + $0x80] ss:$16 sm:$0xc] %v334_v4  }
   0xc   :  { %44 = vst [vmem:[#allocation0 + $0x80] ss:$16 sm:$0x30] %v334_v4   ;;  %46 = vst [vmem:[#allocation0 + $0x80] ss:$16 sm:$0xc0] %v334_v4  }
   0xd   :  { %50 = vst [vmem:[#allocation0 + $0x88] ss:$16 sm:$0x3] %v335_v5   ;;  %52 = vst [vmem:[#allocation0 + $0x88] ss:$16 sm:$0xc] %v335_v5  }
   0xe   :  { %54 = vst [vmem:[#allocation0 + $0x88] ss:$16 sm:$0x30] %v335_v5   ;;  %56 = vst [vmem:[#allocation0 + $0x88] ss:$16 sm:$0xc0] %v335_v5  }
   0xf   :  { %v336_v6 = vld [vmem:[%s499_s0 + $0x30] sm:$0xff]   ;;  %v337_v7 = vld [vmem:[%s499_s0 + $0x38] sm:$0xff]   ;;  %v81_v8 = vld [vmem:[#allocation0] sm:$0x3] }
  0x10   :  { %60 = vst [vmem:[#allocation0 + $0x81] ss:$16 sm:$0x3] %v336_v6   ;;  %62 = vst [vmem:[#allocation0 + $0x81] ss:$16 sm:$0xc] %v336_v6  }
  0x11   :  { %64 = vst [vmem:[#allocation0 + $0x81] ss:$16 sm:$0x30] %v336_v6   ;;  %66 = vst [vmem:[#allocation0 + $0x81] ss:$16 sm:$0xc0] %v336_v6  }
  0x12   :  { %70 = vst [vmem:[#allocation0 + $0x89] ss:$16 sm:$0x3] %v337_v7   ;;  %72 = vst [vmem:[#allocation0 + $0x89] ss:$16 sm:$0xc] %v337_v7  }
  0x13   :  { %74 = vst [vmem:[#allocation0 + $0x89] ss:$16 sm:$0x30] %v337_v7   ;;  %76 = vst [vmem:[#allocation0 + $0x89] ss:$16 sm:$0xc0] %v337_v7  }
  0x14   :  { %v92_v9 = vld [vmem:[#allocation0 + $0x10] sm:$0x3]  ;;  %v106_v10 = vld [vmem:[#allocation0 + $0x20] sm:$0x3]  ;;  %84 = vst [vmem:[%s500_s1] sm:$0x3] %v81_v8 }
  0x15   :  { %v86_v11 = vld [vmem:[#allocation0 + $0x8] sm:$0x3]  ;;  %339 = vst [vmem:[%s500_s1 + $0x4] sm:$0x3] %v92_v9  ;;  %v99_v12 = vld [vmem:[#allocation0 + $0x18] sm:$0x3] }
  0x16   :  { %341 = vst [vmem:[%s500_s1 + $0x8] sm:$0x3] %v106_v10  ;;  %v113_v13 = vld [vmem:[#allocation0 + $0x28] sm:$0x3]  ;;  %338 = vst [vmem:[%s500_s1 + $0x2] sm:$0x3] %v86_v11 }
  0x17   :  { %340 = vst [vmem:[%s500_s1 + $0x6] sm:$0x3] %v99_v12  ;;  %342 = vst [vmem:[%s500_s1 + $0xa] sm:$0x3] %v113_v13  ;;  %v120_v14 = vld [vmem:[#allocation0 + $0x30] sm:$0x3] }
  0x18   :  { %v127_v15 = vld [vmem:[#allocation0 + $0x38] sm:$0x3]  ;;  %v134_v16 = vld [vmem:[#allocation0 + $0x40] sm:$0x3]  ;;  %343 = vst [vmem:[%s500_s1 + $0xc] sm:$0x3] %v120_v14 }
  0x19   :  { %344 = vst [vmem:[%s500_s1 + $0xe] sm:$0x3] %v127_v15  ;;  %345 = vst [vmem:[%s500_s1 + $0x10] sm:$0x3] %v134_v16  ;;  %v141_v17 = vld [vmem:[#allocation0 + $0x48] sm:$0x3] }
  0x1a   :  { %v148_v18 = vld [vmem:[#allocation0 + $0x50] sm:$0x3]  ;;  %v155_v19 = vld [vmem:[#allocation0 + $0x58] sm:$0x3]  ;;  %346 = vst [vmem:[%s500_s1 + $0x12] sm:$0x3] %v141_v17 }
  0x1b   :  { %347 = vst [vmem:[%s500_s1 + $0x14] sm:$0x3] %v148_v18  ;;  %348 = vst [vmem:[%s500_s1 + $0x16] sm:$0x3] %v155_v19  ;;  %v162_v20 = vld [vmem:[#allocation0 + $0x60] sm:$0x3] }
  0x1c   :  { %v169_v21 = vld [vmem:[#allocation0 + $0x68] sm:$0x3]  ;;  %v176_v22 = vld [vmem:[#allocation0 + $0x70] sm:$0x3]  ;;  %349 = vst [vmem:[%s500_s1 + $0x18] sm:$0x3] %v162_v20 }
  0x1d   :  { %350 = vst [vmem:[%s500_s1 + $0x1a] sm:$0x3] %v169_v21  ;;  %351 = vst [vmem:[%s500_s1 + $0x1c] sm:$0x3] %v176_v22  ;;  %v183_v23 = vld [vmem:[#allocation0 + $0x78] sm:$0x3] }
  0x1e   :  { %v190_v24 = vld [vmem:[#allocation0 + $0x80] sm:$0x3]  ;;  %v197_v25 = vld [vmem:[#allocation0 + $0x88] sm:$0x3]  ;;  %352 = vst [vmem:[%s500_s1 + $0x1e] sm:$0x3] %v183_v23 }
  0x1f   :  { %353 = vst [vmem:[%s500_s1 + $0x20] sm:$0x3] %v190_v24  ;;  %354 = vst [vmem:[%s500_s1 + $0x22] sm:$0x3] %v197_v25  ;;  %v204_v26 = vld [vmem:[#allocation0 + $0x90] sm:$0x3] }
  0x20   :  { %v211_v27 = vld [vmem:[#allocation0 + $0x98] sm:$0x3]  ;;  %v218_v28 = vld [vmem:[#allocation0 + $0xa0] sm:$0x3]  ;;  %355 = vst [vmem:[%s500_s1 + $0x24] sm:$0x3] %v204_v26 }
  0x21   :  { %356 = vst [vmem:[%s500_s1 + $0x26] sm:$0x3] %v211_v27  ;;  %357 = vst [vmem:[%s500_s1 + $0x28] sm:$0x3] %v218_v28  ;;  %v225_v29 = vld [vmem:[#allocation0 + $0xa8] sm:$0x3] }
  0x22   :  { %v232_v30 = vld [vmem:[#allocation0 + $0xb0] sm:$0x3]  ;;  %v239_v31 = vld [vmem:[#allocation0 + $0xb8] sm:$0x3]  ;;  %358 = vst [vmem:[%s500_s1 + $0x2a] sm:$0x3] %v225_v29 }
  0x23   :  { %359 = vst [vmem:[%s500_s1 + $0x2c] sm:$0x3] %v232_v30  ;;  %360 = vst [vmem:[%s500_s1 + $0x2e] sm:$0x3] %v239_v31  ;;  %v246_v32 = vld [vmem:[#allocation0 + $0xc0] sm:$0x3] }
  0x24   :  { %v253_v33 = vld [vmem:[#allocation0 + $0xc8] sm:$0x3]  ;;  %v260_v34 = vld [vmem:[#allocation0 + $0xd0] sm:$0x3]  ;;  %361 = vst [vmem:[%s500_s1 + $0x30] sm:$0x3] %v246_v32 }
  0x25   :  { %362 = vst [vmem:[%s500_s1 + $0x32] sm:$0x3] %v253_v33  ;;  %363 = vst [vmem:[%s500_s1 + $0x34] sm:$0x3] %v260_v34  ;;  %v267_v35 = vld [vmem:[#allocation0 + $0xd8] sm:$0x3] }
  0x26   :  { %v274_v36 = vld [vmem:[#allocation0 + $0xe0] sm:$0x3]  ;;  %v281_v37 = vld [vmem:[#allocation0 + $0xe8] sm:$0x3]  ;;  %364 = vst [vmem:[%s500_s1 + $0x36] sm:$0x3] %v267_v35 }
  0x27   :  { %365 = vst [vmem:[%s500_s1 + $0x38] sm:$0x3] %v274_v36  ;;  %366 = vst [vmem:[%s500_s1 + $0x3a] sm:$0x3] %v281_v37  ;;  %v288_v38 = vld [vmem:[#allocation0 + $0xf0] sm:$0x3] }
  0x28   :  { %v295_v39 = vld [vmem:[#allocation0 + $0xf8] sm:$0x3]  ;;  %367 = vst [vmem:[%s500_s1 + $0x3c] sm:$0x3] %v288_v38 }
  0x29   :  { %368 = vst [vmem:[%s500_s1 + $0x3e] sm:$0x3] %v295_v39 }

// kernel: rd_soft_attention_forward.1
= control target key start
LH: loop header
LB: loop body
LE: loop exit
PB: predicated region body
PF: predicated region fallthrough
CT: control target
= control target key end

     0   :  { %s1111_s21 = smov 0   ;;  %s1195_s0 = inlined_call_operand.vmem [shape: bf16[4,72,512], index: 0, kind: input, shape index: {}]   ;;  %s1196_s1 = inlined_call_operand.vmem [shape: bf16[4,32,256], index: 1, kind: input, shape index: {}]   ;;  %s1197_s2 = inlined_call_operand.vmem [shape: bf16[4,32,72], index: 2, kind: input, shape index: {}]   ;;  %s1198_s3 = inlined_call_operand.vmem [shape: f32[4,32,1], index: 3, kind: input, shape index: {}]   ;;  %s1199_s4 = inlined_call_operand.vmem [shape: bf16[4,16,32], index: 4, kind: input, shape index: {}]   ;;  %s1200_s5 = inlined_call_operand.vmem [shape: bf16[4,16,32], index: 5, kind: input, shape index: {}]   ;;  %s1201_s6 = inlined_call_operand.vmem [shape: f32[4,16,512], index: 6, kind: output, shape index: {}]  }
   0x1 LB: > { %s954_s22 = sadd.s32 4294967295, %s1073_s21   ;;  %p958_p0 = scmp.ge.s32.totalorder %s1073_s21, 1  ;;  %s1073_s21 = sphi %s1111_s21, %s16_s21  }
   0x2   : > { %p262_p1 = scmp.lt.s32.totalorder %s1073_s21, 5 }
   0x4   : > { %p263_p2 = pnand %p958_p0, %p262_p1 }
   0x5   : > { %p317_p3 = scmp.lt.s32.totalorder (!%p263_p2), %s954_s22, 3 }
   0x6   : > { %266 = sbr.rel (%p263_p2) target bundleno = 463 (0x1cf), region = 44 }
   0xb   : > { %v1075_v0 = vmov 0   ;;  %s1203_s22 = smov (!%p317_p3, %s954_s22), 3  ;;  %vm506_vm0 = vcmask 1043456   ;;  %vm499_vm1 = vcmask 588800   ;;  %vm682_vm2 = vcmask 261120  }
   0xc   : > { %551 = vmatprep.mubr.bf16.mxu0 %v1075_v0  ;;  %604 = vmatprep.mubr.bf16.mxu1 %v1075_v0  ;;  %s1017_s23 = smul.u32 144, %s1203_s22  ;;  %s1012_s24 = sshll.u32 %s1203_s22, 4 }
   0xd   : > { %1028 = vset.pattern.permute.xlu1 %v1075_v0  ;;  %1027 = vset.pattern.permute.xlu0 %v1075_v0  ;;  %s1130_s27 = scalar_lea.vmem %s1197_s2, %s1012_s24  ;;  %s1011_s7 = sshll.u32 %s1203_s22, 5 }
   0xe   : > { %s1135_s30 = scalar_lea.vmem %s1195_s0, %s1017_s23  ;;  %s336_s10 = scalar_lea.vmem %s1198_s3, %s1011_s7  ;;  %v1057_v29 = vld [vmem:[%s1130_s27] sm:$0xff]   ;;  %v1058_v30 = vld [vmem:[%s1130_s27 + $0x8] sm:$0xff]  }
   0xf   : > { %v373_v1 = vld [vmem:[%s1135_s30 + $0x80] sm:$0xff]  ;;  %v374_v2 = vld [vmem:[%s1135_s30 + $0x88] sm:$0xff]  ;;  %s1159_s13 = scalar_lea.vmem %s1196_s1, %s1011_s7  ;;  %v377_v24 = vld [vmem:[%s336_s10 + $0x10] sm:$0xff]  ;;  %s1014_s14 = sshll.u32 %s1203_s22, 3 }
  0x10   : > { %v991_v3 = vcombine.high %v373_v1, %v373_v1  ;;  %v993_v4 = vcombine.high %v374_v2, %v374_v2  ;;  %v990_v5 = vcombine.low %v373_v1, %v373_v1  ;;  %v992_v6 = vcombine.low %v374_v2, %v374_v2  ;;  %v1033_v7 = vld [vmem:[%s1135_s30 + $0x64] ss:$16 sps:$4 sm:$0xff]   ;;  %v1035_v8 = vld [vmem:[%s1135_s30 + $0x6c] ss:$16 sps:$4 sm:$0xff]   ;;  %v1037_v11 = vld [vmem:[%s1135_s30 + $0x60] ss:$16 sps:$4 sm:$0xff]   ;;  %391 = vperm.xlu0 %1027, %v377_v24   ;;  %s346_s17 = scalar_lea.vmem %s1200_s5, %s1014_s14  ;;  %s1183_s20 = scalar_lea.vmem %s1199_s4, %s1014_s14 }
  0x11   : > { %v1038_v12 = vld [vmem:[%s1135_s30 + $0x68] ss:$16 sps:$4 sm:$0xff]   ;;  %v1039_v13 = vld [vmem:[%s1135_s30 + $0x44] ss:$16 sps:$4 sm:$0xff]   ;;  %v1041_v14 = vld [vmem:[%s1135_s30 + $0x4c] ss:$16 sps:$4 sm:$0xff]  }
  0x12   : > { %994 = vmatprep.subr.msk.bf16.mxu0 %vm506_vm0, %v991_v3  ;;  %997 = vmatprep.subr.msk.bf16.mxu1 %vm506_vm0, %v993_v4  ;;  %v508_v9 = vsel %vm506_vm0, %v990_v5, 0  ;;  %v514_v10 = vsel %vm506_vm0, %v992_v6, 0  ;;  %v1043_v15 = vld [vmem:[%s1135_s30 + $0x40] ss:$16 sps:$4 sm:$0xff]   ;;  %v1044_v16 = vld [vmem:[%s1135_s30 + $0x48] ss:$16 sps:$4 sm:$0xff]  }
  0x13   : > { %526 = vmatpush1.bf16.msra.mxu0 %v508_v9  ;;  %579 = vmatpush1.bf16.msra.mxu1 %v514_v10  ;;  %v1045_v17 = vld [vmem:[%s1135_s30 + $0x24] ss:$16 sps:$4 sm:$0xff]   ;;  %v1047_v18 = vld [vmem:[%s1135_s30 + $0x2c] ss:$16 sps:$4 sm:$0xff]   ;;  %v1049_v19 = vld [vmem:[%s1135_s30 + $0x20] ss:$16 sps:$4 sm:$0xff]  }
  0x14   : > { %527 = vmatprep.subr.bf16.mxu0 %v1033_v7  ;;  %580 = vmatprep.subr.bf16.mxu1 %v1035_v8  ;;  %v1050_v20 = vld [vmem:[%s1135_s30 + $0x28] ss:$16 sps:$4 sm:$0xff]   ;;  %v1051_v21 = vld [vmem:[%s1135_s30 + $0x4] ss:$16 sps:$4 sm:$0xff]   ;;  %v1053_v23 = vld [vmem:[%s1135_s30 + $0xc] ss:$16 sps:$4 sm:$0xff]  }
  0x15   : > { %v375_v22 = vld [vmem:[%s336_s10] sm:$0xff]  ;;  %v376_v25 = vld [vmem:[%s336_s10 + $0x8] sm:$0xff]  ;;  %v378_v26 = vld [vmem:[%s336_s10 + $0x18] sm:$0xff]  ;;  %s1016_s23 = sshll.u32 %s1203_s22, 6 }
  0x16   : > { %381 = vperm.xlu1 %1028, %v375_v22   ;;  %v1055_v27 = vld [vmem:[%s1135_s30] ss:$16 sps:$4 sm:$0xff]   ;;  %v1056_v28 = vld [vmem:[%s1135_s30 + $0x8] ss:$16 sps:$4 sm:$0xff]   ;;  %396 = vperm.xlu0 %1027, %v378_v26   ;;  %v1061_v31 = vld [vmem:[%s1159_s13 + $0x14] ss:$8 sps:$4 sm:$0xff]   ;;  %s351_s26 = scalar_lea.vmem %s1201_s6, %s1016_s23 }
  0x17   : > { %528 = vmatpush1.bf16.msra.mxu0 %v1037_v11  ;;  %581 = vmatpush1.bf16.msra.mxu1 %v1038_v12  ;;  %v1059_v32 = vld [vmem:[%s1159_s13 + $0x10] ss:$8 sps:$4 sm:$0xff]   ;;  %v1064_v33 = vld [vmem:[%s1159_s13 + $0x4] ss:$8 sps:$4 sm:$0xff]   ;;  %v1062_v34 = vld [vmem:[%s1159_s13] ss:$8 sps:$4 sm:$0xff]  }
  0x18   : > { %529 = vmatprep.subr.bf16.mxu0 %v1039_v13  ;;  %582 = vmatprep.subr.bf16.mxu1 %v1041_v14  ;;  %v1065_v35 = vld [vmem:[%s346_s17] sm:$0xff]  }
  0x1a   : > { %386 = vperm.xlu1 %1028, %v376_v25  }
  0x1b   : > { %530 = vmatpush1.bf16.msra.mxu0 %v1043_v15  ;;  %583 = vmatpush1.bf16.msra.mxu1 %v1044_v16 }
  0x1c   : > { %531 = vmatprep.subr.bf16.mxu0 %v1045_v17  ;;  %584 = vmatprep.subr.bf16.mxu1 %v1047_v18 }
  0x1f   : > { %532 = vmatpush1.bf16.msra.mxu0 %v1049_v19  ;;  %585 = vmatpush1.bf16.msra.mxu1 %v1050_v20 }
  0x20   : > { %533 = vmatprep.subr.bf16.mxu0 %v1051_v21  ;;  %586 = vmatprep.subr.bf16.mxu1 %v1053_v23 }
  0x23   : > { %534 = vmatpush1.bf16.msra.mxu0 %v1055_v27  ;;  %587 = vmatpush1.bf16.msra.mxu1 %v1056_v28 }
  0x24   : > { %698 = vmatprep.subr.bf16.mxu0 %v1061_v31 }
  0x26   : > { %995 = vmatmul.mubr.msk.bf16.vlgmr.msra.gmra.mxu0 %vm499_vm1, %v1057_v29  ;;  %998 = vmatmul.mubr.msk.bf16.vlgmr.msra.gmra.mxu1 %vm499_vm1, %v1057_v29 }
  0x27   : > { %561 = vmatprep.mubr.bf16.mxu0 %v1075_v0  ;;  %614 = vmatprep.mubr.bf16.mxu1 %v1075_v0 }
  0x28   : > { %699 = vmatpush1.bf16.msra.mxu0 %v1059_v32  ;;  %v1066_v32 = vld [vmem:[%s1183_s20] sm:$0xff]  }
  0x29   : > { %700 = vmatprep.subr.bf16.mxu0 %v1064_v33 }
  0x2c   : > { %701 = vmatpush1.bf16.msra.mxu0 %v1062_v34 }
  0x2e   : > { %996 = vmatmul.mubr.msk.bf16.gmra.mxu0 %vm499_vm1, %v1058_v30  ;;  %999 = vmatmul.mubr.msk.bf16.gmra.mxu1 %vm499_vm1, %v1058_v30 }
  0x2f   : > { %718 = vmatprep.mubr.bf16.mxu0 %v1075_v0  ;;  %769 = vmatprep.mubr.bf16.mxu1 %v1075_v0 }
  0x36   : > { %1005 = vmatmul.mubr.msk.bf16.vlgmr.msra.gmra.mxu0 %vm682_vm2, %v1065_v35 }
  0x37   : > { %812 = vmatprep.mubr.bf16.mxu0 %v1075_v0 }
  0x8b   : > { %v392_v43 = vpop.permute.xlu0 %391 }
  0x91   : > { %v382_v42 = vpop.permute.xlu1 %381  ;;  %v397_v51 = vpop.permute.xlu0 %396 }
  0x95   : > { %v387_v50 = vpop.permute.xlu1 %386 }
  0xe6   : > { %v553_v36 = vpop.f32.mrf.mxu0  ;;  %v606_v37 = vpop.f32.mrf.mxu1 }
  0xe7   : > { %v554_v14 = vadd.f32 %v553_v36, %v382_v42  ;;  %v607_v15 = vadd.f32 %v606_v37, %v382_v42 }
  0xe8   : > { %v555_v38 = vpop.f32.mrf.mxu0  ;;  %v608_v39 = vpop.f32.mrf.mxu1 }
  0xe9   : > { %v556_v60 = vadd.f32 %v555_v38, %v382_v42  ;;  %v609_v61 = vadd.f32 %v608_v39, %v382_v42  ;;  %v625_v28 = vmax.f32 %v554_v14, 0.0  ;;  %v627_v29 = vmax.f32 %v607_v15, 0.0 }
  0xea   : > { %v557_v40 = vpop.f32.mrf.mxu0  ;;  %v610_v41 = vpop.f32.mrf.mxu1 }
  0xeb   : > { %v558_v2 = vadd.f32 %v557_v40, %v387_v50  ;;  %v611_v3 = vadd.f32 %v610_v41, %v387_v50  ;;  %v626_v18 = vmax.f32 %v556_v60, 0.0  ;;  %v628_v19 = vmax.f32 %v609_v61, 0.0 }
  0xec   : > { %v559_v44 = vpop.f32.mrf.mxu0  ;;  %v612_v45 = vpop.f32.mrf.mxu1 }
  0xed   : > { %v560_v52 = vadd.f32 %v559_v44, %v387_v50  ;;  %v613_v53 = vadd.f32 %v612_v45, %v387_v50  ;;  %v629_v22 = vmax.f32 %v558_v2, 0.0  ;;  %v631_v23 = vmax.f32 %v611_v3, 0.0 }
  0xee   : > { %v563_v46 = vpop.f32.mrf.mxu0  ;;  %v616_v47 = vpop.f32.mrf.mxu1 }
  0xef   : > { %v564_v62 = vadd.f32 %v563_v46, %v392_v43  ;;  %v617_v63 = vadd.f32 %v616_v47, %v392_v43  ;;  %v630_v6 = vmax.f32 %v560_v52, 0.0  ;;  %v632_v7 = vmax.f32 %v613_v53, 0.0 }
  0xf0   : > { %v565_v48 = vpop.f32.mrf.mxu0  ;;  %v618_v49 = vpop.f32.mrf.mxu1  ;;  %v643_v30 = vpack.c.bf16 %v629_v22, %v625_v28  ;;  %v645_v31 = vpack.c.bf16 %v631_v23, %v627_v29 }
  0xf1   : > { %v566_v56 = vadd.f32 %v565_v48, %v392_v43  ;;  %v619_v57 = vadd.f32 %v618_v49, %v392_v43  ;;  %v633_v16 = vmax.f32 %v564_v62, 0.0  ;;  %v635_v17 = vmax.f32 %v617_v63, 0.0 }
  0xf2   : > { %v567_v54 = vpop.f32.mrf.mxu0  ;;  %v620_v55 = vpop.f32.mrf.mxu1  ;;  %v644_v26 = vpack.c.bf16 %v630_v6, %v626_v18  ;;  %v646_v27 = vpack.c.bf16 %v632_v7, %v628_v19 }
  0xf3   : > { %v568_v58 = vadd.f32 %v567_v54, %v397_v51  ;;  %v621_v59 = vadd.f32 %v620_v55, %v397_v51  ;;  %v634_v10 = vmax.f32 %v566_v56, 0.0  ;;  %v636_v11 = vmax.f32 %v619_v57, 0.0 }
  0xf4   : > { %v569_v0 = vpop.f32.mrf.mxu0  ;;  %v622_v1 = vpop.f32.mrf.mxu1 }
  0xf5   : > { %v570_v4 = vadd.f32 %v569_v0, %v397_v51  ;;  %v623_v5 = vadd.f32 %v622_v1, %v397_v51  ;;  %v637_v8 = vmax.f32 %v568_v58, 0.0  ;;  %v639_v9 = vmax.f32 %v621_v59, 0.0 }
  0xf6   : > { %v720_v33 = vpop.f32.mrf.mxu0 }
  0xf7   : > { %v638_v12 = vmax.f32 %v570_v4, 0.0  ;;  %v640_v13 = vmax.f32 %v623_v5, 0.0  ;;  %v647_v24 = vpack.c.bf16 %v637_v8, %v633_v16  ;;  %v649_v25 = vpack.c.bf16 %v639_v9, %v635_v17 }
  0xf8   : > { %v722_v34 = vpop.f32.mrf.mxu0 }
  0xf9   : > { %v648_v20 = vpack.c.bf16 %v638_v12, %v634_v10  ;;  %v650_v21 = vpack.c.bf16 %v640_v13, %v636_v11 }
  0xfa   : > { %v724_v35 = vpop.f32.mrf.mxu0 }
  0xfb   : > { %749 = vmatprep.subr.bf16.mxu1 %v648_v20  ;;  %792 = vmatprep.subr.bf16.mxu0 %v650_v21 }
  0xfc   : > { %750 = vmatpush1.bf16.msra.mxu1 %v647_v24  ;;  %793 = vmatpush1.bf16.msra.mxu0 %v649_v25  ;;  %v726_v36 = vpop.f32.mrf.mxu0 }
  0xfd   : > { %751 = vmatprep.subr.bf16.mxu1 %v644_v26  ;;  %794 = vmatprep.subr.bf16.mxu0 %v646_v27 }
 0x100   : > { %752 = vmatpush1.bf16.msra.mxu1 %v643_v30  ;;  %795 = vmatpush1.bf16.msra.mxu0 %v645_v31 }
 0x103   : > { %1007 = vmatmul.mubr.msk.bf16.vlgmr.msra.gmra.mxu1 %vm682_vm2, %v1066_v32  ;;  %1008 = vmatmul.mubr.msk.bf16.vlgmr.msra.gmra.mxu0 %vm682_vm2, %v1066_v32 }
 0x1c3   : > { %v771_v37 = vpop.f32.mrf.mxu1  ;;  %v814_v38 = vpop.f32.mrf.mxu0 }
 0x1c4   : > { %v772_v39 = vadd.f32 %v771_v37, %v720_v33  ;;  %v815_v40 = vadd.f32 %v814_v38, %v720_v33 }
 0x1c5   : > { %v773_v41 = vpop.f32.mrf.mxu1  ;;  %v816_v42 = vpop.f32.mrf.mxu0 }
 0x1c6   : > { %v823_v43 = vmax.f32 %v772_v39, 0.0  ;;  %v825_v44 = vmax.f32 %v815_v40, 0.0  ;;  %v774_v45 = vadd.f32 %v773_v41, %v722_v34  ;;  %v817_v46 = vadd.f32 %v816_v42, %v722_v34 }
 0x1c7   : > { %v775_v47 = vpop.f32.mrf.mxu1  ;;  %v818_v48 = vpop.f32.mrf.mxu0 }
 0x1c8   : > { %831 = vst [vmem:[%s351_s26] sm:$0xff] %v823_v43  ;;  %833 = vst [vmem:[%s351_s26 + $0x10] sm:$0xff] %v825_v44  ;;  %v824_v49 = vmax.f32 %v774_v45, 0.0  ;;  %v826_v50 = vmax.f32 %v817_v46, 0.0  ;;  %v776_v51 = vadd.f32 %v775_v47, %v724_v35  ;;  %v819_v52 = vadd.f32 %v818_v48, %v724_v35 }
 0x1c9   : > { %v777_v53 = vpop.f32.mrf.mxu1  ;;  %v820_v54 = vpop.f32.mrf.mxu0 }
 0x1ca   : > { %832 = vst [vmem:[%s351_s26 + $0x8] sm:$0xff] %v824_v49  ;;  %834 = vst [vmem:[%s351_s26 + $0x18] sm:$0xff] %v826_v50  ;;  %v827_v55 = vmax.f32 %v776_v51, 0.0  ;;  %v829_v56 = vmax.f32 %v819_v52, 0.0  ;;  %v778_v57 = vadd.f32 %v777_v53, %v726_v36  ;;  %v821_v58 = vadd.f32 %v820_v54, %v726_v36 }
 0x1cc   : > { %835 = vst [vmem:[%s351_s26 + $0x20] sm:$0xff] %v827_v55  ;;  %837 = vst [vmem:[%s351_s26 + $0x30] sm:$0xff] %v829_v56  ;;  %v828_v59 = vmax.f32 %v778_v57, 0.0  ;;  %v830_v60 = vmax.f32 %v821_v58, 0.0 }
 0x1ce   : > { %836 = vst [vmem:[%s351_s26 + $0x28] sm:$0xff] %v828_v59  ;;  %838 = vst [vmem:[%s351_s26 + $0x38] sm:$0xff] %v830_v60 }
 0x1cf PF: > { %s16_s21 = sadd.s32 1, %s1073_s21  }
 0x1d0   : > { %p13_p4 = scmp.ge.s32.totalorder %s16_s21, 6  }
 0x1d2   :  { %15 = sbr.rel (!%p13_p4) target bundleno = 1 (0x1), region = 89 }

</bundles_post_ra>
